<compile_context>
chip_gen: v7x
topology: tpu7x:2x2x1
jax: 0.10.0
libtpu: 0.0.40
codegen_flags: <defaults>
</compile_context>

<pallas_src>
import jax
import jax.numpy as jnp
from jax import lax
from jax.experimental import pallas as pl
from jax.experimental.pallas import tpu as pltpu

LANES = 128
SUBLANES = 8


def _chip_config():
    """Per-generation (tm_rows, npar) defaults."""
    kind = ""
    try:
        kind = jax.devices()[0].device_kind.lower()
    except Exception:
        pass
    if "v5 lite" in kind or "v5e" in kind or "v5lite" in kind:
        # 4096 rows -> 8 MiB f32 double-buffered input: fits 16 MiB scoped default.
        return 4096, 1
    if "v6" in kind:
        # 8192 rows -> 16 MiB of input buffers, trivial vs 128 MiB VMEM; 1 TC.
        return 8192, 1
    if "7" in kind:
        # v7x: 2 TCs per chip, 64 MiB VMEM; 16 MiB of buffers is comfortable.
        # TODO(synk): if a profile shows only one TC active, switch the leading
        # axis to pltpu.CORE_PARALLEL (plain "parallel" may not shard cores).
        return 8192, 2
    return 4096, 1   # conservative default for unknown chips / interpret mode


def _to_rows(x):
    """Flatten to (M, 128) with M % 8 == 0 (zero-pad < 1024 elems only if misaligned)."""
    flat = x.reshape(-1)
    n = flat.shape[0]
    chunk = SUBLANES * LANES
    pad = (-n) % chunk
    if pad:
        # Rare for conv feature maps (N*C*H*W is usually a multiple of 1024).
        flat = jnp.pad(flat, (0, pad))
    return flat.reshape(-1, LANES)


def _make_kernel(tm, bpc, m_rows, mask_needed):
    folds = tm // SUBLANES

    def fold_sum(sq3):
        # (folds, 8, 128) -> (8, 128).  2-level tree for large fold counts so
        # the dependent vreg-add chain does not become the binding unit at
        # TM=8192 (folds=1024) on high-bandwidth chips.
        if folds >= 64 and folds % 16 == 0:
            t = sq3.reshape(folds // 16, 16, SUBLANES, LANES)
            return jnp.sum(jnp.sum(t, axis=1), axis=0)
        return jnp.sum(sq3, axis=0)

    def kernel(x_ref, t_ref, o_ref):
        p = pl.program_id(0)   # parallel (per-core) axis
        i = pl.program_id(1)   # reduction axis

        @pl.when(i == 0)
        def _():
            o_ref[...] = jnp.zeros_like(o_ref)

        d = x_ref[...].astype(jnp.float32) - t_ref[...].astype(jnp.float32)
        sq3 = (d * d).reshape(folds, SUBLANES, LANES)

        if mask_needed:
            blk = p * bpc + i
            valid_rows = m_rows - blk * tm   # >= tm interior, <= 0 phantom
            needs_mask = valid_rows < tm

            @pl.when(jnp.logical_not(needs_mask))
            def _():
                # Interior blocks: no iota / compare / select on the hot path.
                o_ref[...] += fold_sum(sq3)[None]

            @pl.when(needs_mask)
            def _():
                # m_rows % 8 == 0 and block starts are multiples of tm (a
                # multiple of 8), so the valid/invalid boundary falls on a
                # fold boundary: a fold-granular mask is exact.  Pallas-padded
                # garbage rows (even NaN/Inf after squaring) are discarded by
                # the select; phantom blocks get valid_folds <= 0 -> all zero.
                fold_iota = lax.broadcasted_iota(
                    jnp.int32, (folds, SUBLANES, LANES), 0)
                valid_folds = valid_rows // SUBLANES
                masked = jnp.where(fold_iota < valid_folds, sq3, 0.0)
                o_ref[...] += fold_sum(masked)[None]
        else:
            o_ref[...] += fold_sum(sq3)[None]

    return kernel


def make_content_loss(target, *, tm=None, npar=None):
    """Build forward(x) -> (x, loss) for a fixed (detached) target.

    Mirrors ContentLoss: the constructor captures `target`; forward returns the
    input unchanged and the MSE loss (instead of stashing it on module state).
    """
    cfg_tm, cfg_npar = _chip_config()
    tm = cfg_tm if tm is None else tm
    npar = cfg_npar if npar is None else npar

    t_rows = _to_rows(target)        # hoisted: done once, not per forward call
    n_elems = target.size            # true element count for the mean
    m_rows = t_rows.shape[0]         # multiple of 8

    # Snap tm to [8, m_rows] and to a multiple of 8 (guards sweep values).
    tm = max(SUBLANES, min(tm, m_rows))
    tm -= tm % SUBLANES
    # Prefer a nearby divisor of m_rows so mask_needed is False entirely.
    if m_rows % tm != 0:
        for cand in range(tm, max(SUBLANES, tm // 2) - SUBLANES, -SUBLANES):
            if m_rows % cand == 0:
                tm = cand
                break

    n_blocks = pl.cdiv(m_rows, tm)
    npar = max(1, min(npar, n_blocks))
    bpc = pl.cdiv(n_blocks, npar)    # reduction blocks per parallel slot
    phantom = (npar * bpc) != n_blocks
    mask_needed = phantom or (m_rows % tm != 0)

    if phantom:
        def in_map(p, i):
            # Clamp so phantom blocks DMA a valid tile; the in-kernel mask
            # zeroes their contribution.
            return (jnp.minimum(p * bpc + i, n_blocks - 1), 0)
    else:
        def in_map(p, i):
            return (p * bpc + i, 0)

    kernel = _make_kernel(tm, bpc, m_rows, mask_needed)

    # Two inputs x double buffering (worst case f32) + slack for the output
    # slab and compiler scratch.  Stays well under physical VMEM on all chips.
    vmem_limit = 4 * tm * LANES * 4 + (4 << 20)

    call = pl.pallas_call(
        kernel,
        out_shape=jax.ShapeDtypeStruct((npar, SUBLANES, LANES), jnp.float32),
        grid_spec=pltpu.PrefetchScalarGridSpec(
            num_scalar_prefetch=0,
            grid=(npar, bpc),
            in_specs=[
                pl.BlockSpec((tm, LANES), in_map),
                pl.BlockSpec((tm, LANES), in_map),
            ],
            out_specs=pl.BlockSpec((1, SUBLANES, LANES), lambda p, i: (p, 0, 0)),
        ),
        compiler_params=pltpu.CompilerParams(
            dimension_semantics=("parallel", "arbitrary"),
            vmem_limit_bytes=vmem_limit,
        ),
    )

    @jax.jit
    def _loss(x, t):
        # Returns ONLY the loss: no jit pass-through of x, so XLA does not
        # emit a full HBM copy of the feature map.
        x_rows = _to_rows(x)
        partials = call(x_rows, t)
        return jnp.sum(partials) / jnp.float32(n_elems)

    def forward(x):
        if x.size != n_elems:
            raise ValueError(
                f"ContentLoss: input has {x.size} elements, target has {n_elems}")
        loss = _loss(x, t_rows)
        return x, loss   # pass-through at the Python level, like ContentLoss.forward

    return forward


if __name__ == "__main__":
    key = jax.random.PRNGKey(0)
    k_in, k_tgt, k_in2, k_tgt2 = jax.random.split(key, 4)

    # NCHW conv-feature-map-like shape: batch=2, channels=4, spatial=16x16.
    x = jax.random.normal(k_in, (2, 4, 16, 16), dtype=jnp.float32)
    target = jax.random.normal(k_tgt, (2, 4, 16, 16), dtype=jnp.float32)

    forward = make_content_loss(target)
    out, loss = forward(x)
    jax.block_until_ready((out, loss))

    ref_loss = jnp.mean((x - target) ** 2)
    assert jnp.allclose(loss, ref_loss, rtol=1e-5, atol=1e-6), (loss, ref_loss)
    assert jnp.array_equal(out, x)  # forward is a pass-through

    # Misaligned element count (exercises the zero-pad path).
    x2 = jax.random.normal(k_in2, (1, 3, 24, 24), dtype=jnp.float32)
    t2 = jax.random.normal(k_tgt2, (1, 3, 24, 24), dtype=jnp.float32)
    out2, loss2 = make_content_loss(t2)(x2)
    jax.block_until_ready((out2, loss2))
    ref2 = jnp.mean((x2 - t2) ** 2)
    assert jnp.allclose(loss2, ref2, rtol=1e-5, atol=1e-6), (loss2, ref2)
    assert jnp.array_equal(out2, x2)

    # Multi-block + forced partial/phantom path (tm does not divide rows,
    # npar=2 with an odd block count) to exercise the gated mask branch.
    x3 = jax.random.normal(k_in, (3, 8, 32, 32), dtype=jnp.float32)   # 192 rows
    t3 = jax.random.normal(k_tgt, (3, 8, 32, 32), dtype=jnp.float32)
    out3, loss3 = make_content_loss(t3, tm=80, npar=2)(x3)
    jax.block_until_ready((out3, loss3))
    ref3 = jnp.mean((x3 - t3) ** 2)
    assert jnp.allclose(loss3, ref3, rtol=1e-5, atol=1e-6), (loss3, ref3)

    # TODO(synk): gram_matrix in the reference class is an unused static helper
    # (belongs to StyleLoss); not part of ContentLoss.forward, so not kernelized.
    print("KERNEL_OK")
</pallas_src>

<mosaic_0001>
module attributes {stable_mosaic.version = 11 : i64} {
  func.func @kernel(%arg0: i32, %arg1: i32, %arg2: memref<16x128xf32, #tpu.memory_space<vmem>>, %arg3: memref<16x128xf32, #tpu.memory_space<vmem>>, %arg4: memref<1x8x128xf32, #tpu.memory_space<vmem>>) attributes {dimension_semantics = [#tpu.dimension_semantics<parallel>, #tpu.dimension_semantics<arbitrary>], iteration_bounds = array<i64: 1, 1>, scalar_prefetch = 0 : i64, scratch_operands = 0 : i64, tpu.core_type = #tpu.core_type<tc>, window_params = [{transform_indices = @transform_0, window_bounds = array<i64: 16, 128>}, {transform_indices = @transform_1, window_bounds = array<i64: 16, 128>}, {transform_indices = @transform_2, window_bounds = array<i64: 1, 8, 128>}]} {
    %c0_i32 = arith.constant 0 : i32
    %0 = arith.cmpi eq, %arg1, %c0_i32 : i32
    %1 = arith.extui %0 : i1 to i32
    %c0_i32_0 = arith.constant 0 : i32
    %2 = arith.cmpi ne, %1, %c0_i32_0 : i32
    scf.if %2 {
      %cst_10 = arith.constant 0.000000e+00 : f32
      %13 = vector.broadcast %cst_10 : f32 to vector<1x8x128xf32>
      %c0_11 = arith.constant 0 : index
      %c0_12 = arith.constant 0 : index
      %c0_13 = arith.constant 0 : index
      %14 = vector.load %arg4[%c0_11, %c0_12, %c0_13] : memref<1x8x128xf32, #tpu.memory_space<vmem>>, vector<1x8x128xf32>
      tpu.vector_store %arg4[%c0_11, %c0_12, %c0_13], %13 {strides = array<i32>} : memref<1x8x128xf32, #tpu.memory_space<vmem>>, vector<1x8x128xf32>,
    } else {
    }
    %c0 = arith.constant 0 : index
    %c0_1 = arith.constant 0 : index
    %3 = vector.load %arg2[%c0, %c0_1] : memref<16x128xf32, #tpu.memory_space<vmem>>, vector<16x128xf32>
    %c0_2 = arith.constant 0 : index
    %c0_3 = arith.constant 0 : index
    %4 = vector.load %arg3[%c0_2, %c0_3] : memref<16x128xf32, #tpu.memory_space<vmem>>, vector<16x128xf32>
    %5 = arith.subf %3, %4 : vector<16x128xf32>
    %6 = arith.mulf %5, %5 : vector<16x128xf32>
    %7 = vector.shape_cast %6 : vector<16x128xf32> to vector<2x8x128xf32>
    %c0_4 = arith.constant 0 : index
    %c0_5 = arith.constant 0 : index
    %c0_6 = arith.constant 0 : index
    %8 = vector.load %arg4[%c0_4, %c0_5, %c0_6] : memref<1x8x128xf32, #tpu.memory_space<vmem>>, vector<1x8x128xf32>
    %cst = arith.constant dense<0.000000e+00> : vector<8x128xf32>
    %9 = vector.multi_reduction <add>, %7, %cst [0] : vector<2x8x128xf32> to vector<8x128xf32>
    %10 = vector.shape_cast %9 : vector<8x128xf32> to vector<1x8x128xf32>
    %11 = arith.addf %8, %10 : vector<1x8x128xf32>
    %c0_7 = arith.constant 0 : index
    %c0_8 = arith.constant 0 : index
    %c0_9 = arith.constant 0 : index
    %12 = vector.load %arg4[%c0_7, %c0_8, %c0_9] : memref<1x8x128xf32, #tpu.memory_space<vmem>>, vector<1x8x128xf32>
    tpu.vector_store %arg4[%c0_7, %c0_8, %c0_9], %11 {strides = array<i32>} : memref<1x8x128xf32, #tpu.memory_space<vmem>>, vector<1x8x128xf32>,
    return
  }
  func.func @transform_0(%arg0: i32, %arg1: i32) -> (i32, i32) {
    %c1_i32 = arith.constant 1 : i32
    %0 = arith.muli %arg0, %c1_i32 : i32
    %1 = arith.addi %0, %arg1 : i32
    %c0_i32 = arith.constant 0 : i32
    %c0_i32_0 = arith.constant 0 : i32
    return %1, %c0_i32 : i32, i32
  }
  func.func @transform_1(%arg0: i32, %arg1: i32) -> (i32, i32) {
    %c1_i32 = arith.constant 1 : i32
    %0 = arith.muli %arg0, %c1_i32 : i32
    %1 = arith.addi %0, %arg1 : i32
    %c0_i32 = arith.constant 0 : i32
    %c0_i32_0 = arith.constant 0 : i32
    return %1, %c0_i32 : i32, i32
  }
  func.func @transform_2(%arg0: i32, %arg1: i32) -> (i32, i32, i32) {
    %c0_i32 = arith.constant 0 : i32
    %c0_i32_0 = arith.constant 0 : i32
    %c0_i32_1 = arith.constant 0 : i32
    return %arg0, %c0_i32, %c0_i32_0 : i32, i32, i32
  }
}

</mosaic_0001>

<bundles_post_ra>
// kernel: _loss.1
= control target key start
LH: loop header
LB: loop body
LE: loop exit
PB: predicated region body
PF: predicated region fallthrough
CT: control target
= control target key end

     0   :  { %s119_s0 = inlined_call_operand.vmem [shape: f32[16,128], index: 0, kind: input, shape index: {}]   ;;  %s120_s1 = inlined_call_operand.vmem [shape: f32[16,128], index: 1, kind: input, shape index: {}]   ;;  %s121_s2 = inlined_call_operand.vmem [shape: f32[1,8,128], index: 2, kind: output, shape index: {}]  }
   0x1   :  { %v60_v0 = vld [vmem:[%s119_s0] sm:$0xff]  ;;  %v61_v1 = vld [vmem:[%s119_s0 + $0x8] sm:$0xff] }
   0x2   :  { %v62_v2 = vld [vmem:[%s120_s1] sm:$0xff]  ;;  %v63_v3 = vld [vmem:[%s120_s1 + $0x8] sm:$0xff] }
   0x3   :  { %v64_v4 = vsub.f32 %v60_v0, %v62_v2  ;;  %v65_v5 = vsub.f32 %v61_v1, %v63_v3 }
   0x5   :  { %v66_v6 = vmul.f32 %v64_v4, %v64_v4  ;;  %v67_v7 = vmul.f32 %v65_v5, %v65_v5 }
   0x7   :  { %v69_v8 = vadd.f32 %v67_v7, %v66_v6 }
   0x9   :  { %71 = vst [vmem:[%s121_s2] sm:$0xff] %v69_v8 }

</bundles_post_ra>
